<compile_context>
chip_gen: v7x
topology: tpu7x:2x2x1
jax: 0.10.0
libtpu: 0.0.40
codegen_flags: <defaults>
</compile_context>

<pallas_src>
import functools

import jax
import jax.numpy as jnp
from jax.experimental import pallas as pl
from jax.experimental.pallas import tpu as pltpu


_TAPS = tuple((a, b) for a in (-1, 0, 1) for b in (-1, 0, 1))


# ---------------------------------------------------------------------------
# Kernel 1: data-consistency step on the MXU via dense DFT matmuls.
#   dc = ifft2((fft2(x) * P - y) * P)      (torch.fft, norm='backward')
#   x1 = x - gamma * dc
# ---------------------------------------------------------------------------
def _dc_kernel(x_ref, p_ref, y_ref, fh_ref, fw_ref, dc_ref, x1_ref, *, gamma):
    H, W = x_ref.shape[2], x_ref.shape[3]
    xr, xi = x_ref[0, 0], x_ref[0, 1]
    p = p_ref[0]
    yr, yi = y_ref[0, 0], y_ref[0, 1]

    FrH, FiH, IFrH, IFiH = fh_ref[0], fh_ref[1], fh_ref[2], fh_ref[3]
    FrW, FiW, IFrW, IFiW = fw_ref[0], fw_ref[1], fw_ref[2], fw_ref[3]

    dot = lambda a, b: jnp.dot(a, b, preferred_element_type=jnp.float32)

    # forward 2-D DFT:  A = F_H @ (xr + i*xi)  (planes concatenated -> 2 dots)
    xcat = jnp.concatenate([xr, xi], axis=1)                # (H, 2W)
    pr, pi = dot(FrH, xcat), dot(FiH, xcat)
    ar = pr[:, :W] - pi[:, W:]
    ai = pr[:, W:] + pi[:, :W]
    acat = jnp.concatenate([ar, ai], axis=0)                # (2H, W)
    qr, qi = dot(acat, FrW), dot(acat, FiW)
    kr = qr[:H, :] - qi[H:, :]
    ki = qi[:H, :] + qr[H:, :]

    # k-space residual: (fft2(x)*P - y) * P    (P is a real-valued mask)
    kr = (kr * p - yr) * p
    ki = (ki * p - yi) * p

    # inverse 2-D DFT
    kcat = jnp.concatenate([kr, ki], axis=1)
    rr, ri = dot(IFrH, kcat), dot(IFiH, kcat)
    br = rr[:, :W] - ri[:, W:]
    bi = rr[:, W:] + ri[:, :W]
    bcat = jnp.concatenate([br, bi], axis=0)
    sr, si = dot(bcat, IFrW), dot(bcat, IFiW)
    dcr = sr[:H, :] - si[H:, :]
    dci = si[:H, :] + sr[H:, :]

    dc_ref[0, 0] = dcr
    dc_ref[0, 1] = dci
    x1_ref[0, 0] = xr - gamma * dcr
    x1_ref[0, 1] = xi - gamma * dci


def _dft_mats(n):
    # Exact integer (i*j) mod n *before* scaling avoids f32 precision loss of
    # the raw product for large n (correctness fix from review).
    idx = jnp.arange(n, dtype=jnp.int32)
    prod = (idx[:, None] * idx[None, :]) % n
    ang = (2.0 * jnp.pi / n) * prod.astype(jnp.float32)
    fr, fi = jnp.cos(ang), -jnp.sin(ang)               # exp(-2*pi*i*j*k/n)
    ifr, ifi = jnp.cos(ang) / n, jnp.sin(ang) / n      # exp(+2*pi*i*j*k/n)/n
    return jnp.stack([fr, fi, ifr, ifi]).astype(jnp.float32)


def dc_step_pallas(x, P, y_ri, gamma):
    N, _, H, W = x.shape
    FH = _dft_mats(H)
    FW = _dft_mats(W)
    kern = functools.partial(_dc_kernel, gamma=gamma)
    dc, x1 = pl.pallas_call(
        kern,
        out_shape=(jax.ShapeDtypeStruct((N, 2, H, W), jnp.float32),
                   jax.ShapeDtypeStruct((N, 2, H, W), jnp.float32)),
        grid=(N,),
        in_specs=[
            pl.BlockSpec((1, 2, H, W), lambda n: (n, 0, 0, 0)),
            pl.BlockSpec((1, H, W), lambda n: (n, 0, 0)),
            pl.BlockSpec((1, 2, H, W), lambda n: (n, 0, 0, 0)),
            pl.BlockSpec((4, H, H), lambda n: (0, 0, 0)),
            pl.BlockSpec((4, W, W), lambda n: (0, 0, 0)),
        ],
        out_specs=(pl.BlockSpec((1, 2, H, W), lambda n: (n, 0, 0, 0)),
                   pl.BlockSpec((1, 2, H, W), lambda n: (n, 0, 0, 0))),
        compiler_params=pltpu.CompilerParams(dimension_semantics=("parallel",)),
    )(x, P, y_ri, FH, FW)
    return dc, x1


# ---------------------------------------------------------------------------
# Kernel 2: fully fused EDSR prior + deep-unfolding update.
#   Features live in VMEM as (C, H*W) f32; convs are 9 accumulated bf16 MXU
#   matmuls (f32 accumulation) over lane-rotated, border-masked views.
# ---------------------------------------------------------------------------
def _edsr_du_kernel(x1_ref, dc_ref, mask_ref, hw_ref, hb_ref, bw_ref, bb_ref,
                    tw_ref, tb_ref, o_ref, *, W, n_resblocks, res_scale,
                    gamma, mu):
    HW = x1_ref.shape[2]
    x1 = x1_ref[0]                                    # (2, HW) f32
    dc = dc_ref[0]                                    # (2, HW) f32

    # Static lane-rotation amount per 3x3 tap; border masks loaded once and
    # reused by every conv layer.
    rots = [((a * W + b) % HW) for (a, b) in _TAPS]
    border = [mask_ref[t] for t in range(9)]          # each (1, HW) bf16

    def rot_left(v, k):
        # result[:, i] = v[:, (i + k) % HW]   (explicit, unambiguous shift)
        if k == 0:
            return v
        return jnp.concatenate([v[:, k:], v[:, :k]], axis=1)

    def conv3x3(feat, w_tap, bias, relu):
        """3x3 SAME conv on a VMEM-resident (Cin, HW) feature map."""
        fb = feat.astype(jnp.bfloat16)
        acc = None
        for t, (a, b) in enumerate(_TAPS):
            r = rot_left(fb, rots[t])
            if not (a == 0 and b == 0):
                r = r * border[t]                     # zero the wrapped border
            d = jnp.dot(w_tap(t), r, preferred_element_type=jnp.float32)
            acc = d if acc is None else acc + d
        acc = acc + bias                              # (Cout, 1) broadcast
        if relu:
            acc = jnp.maximum(acc, 0.0)
        return acc

    # EDSR: head -> ResBlocks -> body-tail conv (+skip) -> tail, all in VMEM;
    # bias / ReLU / res_scale / skip adds fused as epilogues.
    h0 = conv3x3(x1, lambda t: hw_ref[t], hb_ref[...], relu=False)
    r = h0
    for i in range(n_resblocks):
        l1, l2 = 2 * i, 2 * i + 1
        t1 = conv3x3(r, lambda t, l=l1: bw_ref[9 * l + t], bb_ref[l1],
                     relu=True)
        t2 = conv3x3(t1, lambda t, l=l2: bw_ref[9 * l + t], bb_ref[l2],
                     relu=False)
        r = r + res_scale * t2
    lb = 2 * n_resblocks
    r = conv3x3(r, lambda t: bw_ref[9 * lb + t], bb_ref[lb], relu=False)
    r = r + h0
    prior = conv3x3(r, lambda t: tw_ref[t], tb_ref[...], relu=False)  # (2, HW)

    # Fused deep-unfolding update; only this 2-channel result goes to HBM.
    o_ref[0] = x1 - gamma * (dc + mu * (prior - x1))


def _border_masks(H, W):
    """(9, 1, H*W) bf16 {0,1} masks: zero-padding validity per 3x3 tap."""
    HW = H * W
    p = jnp.arange(HW, dtype=jnp.int32)
    h_idx, w_idx = p // W, p % W
    masks = []
    for (a, b) in _TAPS:
        ok = ((h_idx + a >= 0) & (h_idx + a < H) &
              (w_idx + b >= 0) & (w_idx + b < W))
        masks.append(ok)
    return jnp.stack(masks).astype(jnp.float32).astype(jnp.bfloat16).reshape(
        9, 1, HW)


def pack_edsr_params(params):
    """Repack HWIO conv weights into per-tap (Cout, Cin) bf16 matrices and
    (Cout, 1) f32 biases for the fused kernel."""
    def w_taps(w):
        cout, cin = w.shape[3], w.shape[2]
        return (jnp.transpose(w, (0, 1, 3, 2))
                .reshape(9, cout, cin).astype(jnp.bfloat16))

    body_w, body_b = [], []
    for (cw1, cw2) in params["blocks"]:
        for (w, b) in (cw1, cw2):
            body_w.append(w_taps(w))
            body_b.append(b)
    body_w.append(w_taps(params["body_tail"][0]))
    body_b.append(params["body_tail"][1])
    nf = params["head"][0].shape[3]
    return {
        "head_w": w_taps(params["head"][0]),                             # (9,F,2)
        "head_b": params["head"][1].reshape(nf, 1).astype(jnp.float32),
        "body_w": jnp.concatenate(body_w, axis=0),                       # (9L,F,F)
        "body_b": jnp.stack(body_b).reshape(-1, nf, 1).astype(jnp.float32),
        "tail_w": w_taps(params["tail"][0]),                             # (9,2,F)
        "tail_b": params["tail"][1].reshape(2, 1).astype(jnp.float32),
    }


def edsr_du_pallas(x1, dc, kparams, gamma, mu, res_scale):
    N, _, H, W = x1.shape
    HW = H * W
    # Free reshapes only (NCHW row-major == (N, 2, H*W)); no transposes/pads.
    x1f = x1.reshape(N, 2, HW)
    dcf = dc.reshape(N, 2, HW)
    masks = _border_masks(H, W)
    hw, hb = kparams["head_w"], kparams["head_b"]
    bw, bb = kparams["body_w"], kparams["body_b"]
    tw, tb = kparams["tail_w"], kparams["tail_b"]
    n_resblocks = (bb.shape[0] - 1) // 2
    kern = functools.partial(_edsr_du_kernel, W=W, n_resblocks=n_resblocks,
                             res_scale=res_scale, gamma=gamma, mu=mu)

    def whole(shape):
        return pl.BlockSpec(shape, lambda n: (0,) * len(shape))

    out = pl.pallas_call(
        kern,
        out_shape=jax.ShapeDtypeStruct((N, 2, HW), jnp.float32),
        grid=(N,),
        in_specs=[
            pl.BlockSpec((1, 2, HW), lambda n: (n, 0, 0)),
            pl.BlockSpec((1, 2, HW), lambda n: (n, 0, 0)),
            whole(masks.shape),
            whole(hw.shape), whole(hb.shape),
            whole(bw.shape), whole(bb.shape),
            whole(tw.shape), whole(tb.shape),
        ],
        out_specs=pl.BlockSpec((1, 2, HW), lambda n: (n, 0, 0)),
        compiler_params=pltpu.CompilerParams(dimension_semantics=("parallel",)),
    )(x1f, dcf, masks, hw, hb, bw, bb, tw, tb)
    return out.reshape(N, 2, H, W)


# ---------------------------------------------------------------------------
# Parameter init (stand-in for the torch.load'd pretrained EDSR weights).
# ---------------------------------------------------------------------------
def init_edsr_params(key, n_feats, n_resblocks, in_ch=2, out_ch=2):
    def conv_init(k, cin, cout):
        kw, kb = jax.random.split(k)
        scale = 1.0 / jnp.sqrt(9.0 * cin)
        w = jax.random.normal(kw, (3, 3, cin, cout), jnp.float32) * scale
        b = jax.random.normal(kb, (cout,), jnp.float32) * 0.01
        return w, b

    keys = jax.random.split(key, 3 + 2 * n_resblocks)
    params = {
        "head": conv_init(keys[0], in_ch, n_feats),
        "blocks": [(conv_init(keys[1 + 2 * i], n_feats, n_feats),
                    conv_init(keys[2 + 2 * i], n_feats, n_feats))
                   for i in range(n_resblocks)],
        "body_tail": conv_init(keys[1 + 2 * n_resblocks], n_feats, n_feats),
        "tail": conv_init(keys[2 + 2 * n_resblocks], n_feats, out_ch),
    }
    return params


def deep_unfolding_block(x, P, y_ri, params, gamma, mu, res_scale):
    dc, x1 = dc_step_pallas(x, P, y_ri, gamma)
    kparams = pack_edsr_params(params)
    return edsr_du_pallas(x1, dc, kparams, gamma, mu, res_scale)


# ---------------------------------------------------------------------------
# Pure-JAX reference (jnp.fft + lax.conv) for validation.
# ---------------------------------------------------------------------------
def _conv_ref(x_nhwc, w, b):
    out = jax.lax.conv_general_dilated(
        x_nhwc, w, window_strides=(1, 1), padding="SAME",
        dimension_numbers=("NHWC", "HWIO", "NHWC"))
    return out + b


def _edsr_ref(x_nchw, params, res_scale):
    x = jnp.transpose(x_nchw, (0, 2, 3, 1))
    h = _conv_ref(x, *params["head"])
    r = h
    for ((w1, b1), (w2, b2)) in params["blocks"]:
        t = jnp.maximum(_conv_ref(r, w1, b1), 0.0)
        t = _conv_ref(t, w2, b2)
        r = r + res_scale * t
    r = _conv_ref(r, *params["body_tail"])
    r = r + h
    out = _conv_ref(r, *params["tail"])
    return jnp.transpose(out, (0, 3, 1, 2))


def reference_forward(x, P, y_ri, params, gamma, mu, res_scale):
    xc = x[:, 0] + 1j * x[:, 1]
    yc = y_ri[:, 0] + 1j * y_ri[:, 1]
    k = jnp.fft.fft2(xc) * P
    k = (k - yc) * P
    dcc = jnp.fft.ifft2(k)
    dc = jnp.stack([dcc.real, dcc.imag], axis=1).astype(jnp.float32)
    x1 = x - gamma * dc
    prior = _edsr_ref(x1, params, res_scale)
    return x1 - gamma * (dc + mu * (prior - x1))


if __name__ == "__main__":
    N, H, W = 2, 16, 16
    n_feats, n_resblocks, res_scale = 32, 2, 0.5
    gamma, mu = 0.5, 0.1                                      # gammaValue, muValue

    key = jax.random.PRNGKey(0)
    kx, ky, kp, kparam = jax.random.split(key, 4)
    x = jax.random.normal(kx, (N, 2, H, W), jnp.float32)      # complex image (re/im)
    y_ri = jax.random.normal(ky, (N, 2, H, W), jnp.float32)   # measured k-space (re/im)
    P = jax.random.bernoulli(kp, 0.5, (N, H, W)).astype(jnp.float32)  # sampling mask
    params = init_edsr_params(kparam, n_feats, n_resblocks)

    out = deep_unfolding_block(x, P, y_ri, params, gamma, mu, res_scale)
    out = jax.block_until_ready(out)

    ref = reference_forward(x, P, y_ri, params, gamma, mu, res_scale)
    assert out.shape == (N, 2, H, W)
    rel = float(jnp.linalg.norm(out - ref) / (jnp.linalg.norm(ref) + 1e-12))
    assert rel < 5e-2, f"relative error too large: {rel}"
    print("KERNEL_OK")
</pallas_src>

<mosaic_0001>
module attributes {stable_mosaic.version = 11 : i64} {
  func.func @_dc_kernel(%arg0: i32, %arg1: memref<1x2x16x16xf32, #tpu.memory_space<vmem>>, %arg2: memref<1x16x16xf32, #tpu.memory_space<vmem>>, %arg3: memref<1x2x16x16xf32, #tpu.memory_space<vmem>>, %arg4: memref<4x16x16xf32, #tpu.memory_space<vmem>>, %arg5: memref<4x16x16xf32, #tpu.memory_space<vmem>>, %arg6: memref<1x2x16x16xf32, #tpu.memory_space<vmem>>, %arg7: memref<1x2x16x16xf32, #tpu.memory_space<vmem>>) attributes {dimension_semantics = [#tpu.dimension_semantics<parallel>], iteration_bounds = array<i64: 2>, scalar_prefetch = 0 : i64, scratch_operands = 0 : i64, tpu.core_type = #tpu.core_type<tc>, window_params = [{transform_indices = @transform_0, window_bounds = array<i64: 1, 2, 16, 16>}, {transform_indices = @transform_1, window_bounds = array<i64: 1, 16, 16>}, {transform_indices = @transform_2, window_bounds = array<i64: 1, 2, 16, 16>}, {pipeline_mode = #tpu.pipeline_mode<synchronous>, transform_indices = @transform_3, window_bounds = array<i64: 4, 16, 16>}, {pipeline_mode = #tpu.pipeline_mode<synchronous>, transform_indices = @transform_4, window_bounds = array<i64: 4, 16, 16>}, {transform_indices = @transform_5, window_bounds = array<i64: 1, 2, 16, 16>}, {transform_indices = @transform_6, window_bounds = array<i64: 1, 2, 16, 16>}]} {
    %c0 = arith.constant 0 : index
    %c0_0 = arith.constant 0 : index
    %c0_1 = arith.constant 0 : index
    %c0_2 = arith.constant 0 : index
    %0 = vector.load %arg1[%c0, %c0_0, %c0_1, %c0_2] : memref<1x2x16x16xf32, #tpu.memory_space<vmem>>, vector<1x1x16x16xf32>
    %1 = vector.shape_cast %0 : vector<1x1x16x16xf32> to vector<16x16xf32>
    %c0_3 = arith.constant 0 : index
    %c1 = arith.constant 1 : index
    %c0_4 = arith.constant 0 : index
    %c0_5 = arith.constant 0 : index
    %2 = vector.load %arg1[%c0_3, %c1, %c0_4, %c0_5] : memref<1x2x16x16xf32, #tpu.memory_space<vmem>>, vector<1x1x16x16xf32>
    %3 = vector.shape_cast %2 : vector<1x1x16x16xf32> to vector<16x16xf32>
    %c0_6 = arith.constant 0 : index
    %c0_7 = arith.constant 0 : index
    %c0_8 = arith.constant 0 : index
    %4 = vector.load %arg2[%c0_6, %c0_7, %c0_8] : memref<1x16x16xf32, #tpu.memory_space<vmem>>, vector<1x16x16xf32>
    %5 = vector.shape_cast %4 : vector<1x16x16xf32> to vector<16x16xf32>
    %c0_9 = arith.constant 0 : index
    %c0_10 = arith.constant 0 : index
    %c0_11 = arith.constant 0 : index
    %c0_12 = arith.constant 0 : index
    %6 = vector.load %arg3[%c0_9, %c0_10, %c0_11, %c0_12] : memref<1x2x16x16xf32, #tpu.memory_space<vmem>>, vector<1x1x16x16xf32>
    %7 = vector.shape_cast %6 : vector<1x1x16x16xf32> to vector<16x16xf32>
    %c0_13 = arith.constant 0 : index
    %c1_14 = arith.constant 1 : index
    %c0_15 = arith.constant 0 : index
    %c0_16 = arith.constant 0 : index
    %8 = vector.load %arg3[%c0_13, %c1_14, %c0_15, %c0_16] : memref<1x2x16x16xf32, #tpu.memory_space<vmem>>, vector<1x1x16x16xf32>
    %9 = vector.shape_cast %8 : vector<1x1x16x16xf32> to vector<16x16xf32>
    %c0_17 = arith.constant 0 : index
    %c0_18 = arith.constant 0 : index
    %c0_19 = arith.constant 0 : index
    %10 = vector.load %arg4[%c0_17, %c0_18, %c0_19] : memref<4x16x16xf32, #tpu.memory_space<vmem>>, vector<1x16x16xf32>
    %11 = vector.shape_cast %10 : vector<1x16x16xf32> to vector<16x16xf32>
    %c1_20 = arith.constant 1 : index
    %c0_21 = arith.constant 0 : index
    %c0_22 = arith.constant 0 : index
    %12 = vector.load %arg4[%c1_20, %c0_21, %c0_22] : memref<4x16x16xf32, #tpu.memory_space<vmem>>, vector<1x16x16xf32>
    %13 = vector.shape_cast %12 : vector<1x16x16xf32> to vector<16x16xf32>
    %c2 = arith.constant 2 : index
    %c0_23 = arith.constant 0 : index
    %c0_24 = arith.constant 0 : index
    %14 = vector.load %arg4[%c2, %c0_23, %c0_24] : memref<4x16x16xf32, #tpu.memory_space<vmem>>, vector<1x16x16xf32>
    %15 = vector.shape_cast %14 : vector<1x16x16xf32> to vector<16x16xf32>
    %c3 = arith.constant 3 : index
    %c0_25 = arith.constant 0 : index
    %c0_26 = arith.constant 0 : index
    %16 = vector.load %arg4[%c3, %c0_25, %c0_26] : memref<4x16x16xf32, #tpu.memory_space<vmem>>, vector<1x16x16xf32>
    %17 = vector.shape_cast %16 : vector<1x16x16xf32> to vector<16x16xf32>
    %c0_27 = arith.constant 0 : index
    %c0_28 = arith.constant 0 : index
    %c0_29 = arith.constant 0 : index
    %18 = vector.load %arg5[%c0_27, %c0_28, %c0_29] : memref<4x16x16xf32, #tpu.memory_space<vmem>>, vector<1x16x16xf32>
    %19 = vector.shape_cast %18 : vector<1x16x16xf32> to vector<16x16xf32>
    %c1_30 = arith.constant 1 : index
    %c0_31 = arith.constant 0 : index
    %c0_32 = arith.constant 0 : index
    %20 = vector.load %arg5[%c1_30, %c0_31, %c0_32] : memref<4x16x16xf32, #tpu.memory_space<vmem>>, vector<1x16x16xf32>
    %21 = vector.shape_cast %20 : vector<1x16x16xf32> to vector<16x16xf32>
    %c2_33 = arith.constant 2 : index
    %c0_34 = arith.constant 0 : index
    %c0_35 = arith.constant 0 : index
    %22 = vector.load %arg5[%c2_33, %c0_34, %c0_35] : memref<4x16x16xf32, #tpu.memory_space<vmem>>, vector<1x16x16xf32>
    %23 = vector.shape_cast %22 : vector<1x16x16xf32> to vector<16x16xf32>
    %c3_36 = arith.constant 3 : index
    %c0_37 = arith.constant 0 : index
    %c0_38 = arith.constant 0 : index
    %24 = vector.load %arg5[%c3_36, %c0_37, %c0_38] : memref<4x16x16xf32, #tpu.memory_space<vmem>>, vector<1x16x16xf32>
    %25 = vector.shape_cast %24 : vector<1x16x16xf32> to vector<16x16xf32>
    %26 = tpu.concatenate %1, %3 in 1 : vector<16x16xf32>, vector<16x16xf32> -> vector<16x32xf32>
    %cst = arith.constant dense<0.000000e+00> : vector<16x32xf32>
    %27 = tpu.matmul %11, %26, %cst {dimension_numbers = #tpu.dot_dimension_numbers<[1], [0], [0], [1], [0, 0, 1, 1], [], []>} : vector<16x16xf32>, vector<16x32xf32>, vector<16x32xf32> -> vector<16x32xf32>
    %cst_39 = arith.constant dense<0.000000e+00> : vector<16x32xf32>
    %28 = tpu.matmul %13, %26, %cst_39 {dimension_numbers = #tpu.dot_dimension_numbers<[1], [0], [0], [1], [0, 0, 1, 1], [], []>} : vector<16x16xf32>, vector<16x32xf32>, vector<16x32xf32> -> vector<16x32xf32>
    %29 = vector.extract_strided_slice %27 {offsets = [0, 0], sizes = [16, 16], strides = [1, 1]} : vector<16x32xf32> to vector<16x16xf32>
    %30 = vector.extract_strided_slice %28 {offsets = [0, 16], sizes = [16, 16], strides = [1, 1]} : vector<16x32xf32> to vector<16x16xf32>
    %31 = arith.subf %29, %30 : vector<16x16xf32>
    %32 = vector.extract_strided_slice %27 {offsets = [0, 16], sizes = [16, 16], strides = [1, 1]} : vector<16x32xf32> to vector<16x16xf32>
    %33 = vector.extract_strided_slice %28 {offsets = [0, 0], sizes = [16, 16], strides = [1, 1]} : vector<16x32xf32> to vector<16x16xf32>
    %34 = arith.addf %32, %33 : vector<16x16xf32>
    %35 = tpu.concatenate %31, %34 in 0 : vector<16x16xf32>, vector<16x16xf32> -> vector<32x16xf32>
    %cst_40 = arith.constant dense<0.000000e+00> : vector<32x16xf32>
    %36 = tpu.matmul %35, %19, %cst_40 {dimension_numbers = #tpu.dot_dimension_numbers<[1], [0], [0], [1], [0, 0, 1, 1], [], []>} : vector<32x16xf32>, vector<16x16xf32>, vector<32x16xf32> -> vector<32x16xf32>
    %cst_41 = arith.constant dense<0.000000e+00> : vector<32x16xf32>
    %37 = tpu.matmul %35, %21, %cst_41 {dimension_numbers = #tpu.dot_dimension_numbers<[1], [0], [0], [1], [0, 0, 1, 1], [], []>} : vector<32x16xf32>, vector<16x16xf32>, vector<32x16xf32> -> vector<32x16xf32>
    %38 = vector.extract_strided_slice %36 {offsets = [0, 0], sizes = [16, 16], strides = [1, 1]} : vector<32x16xf32> to vector<16x16xf32>
    %39 = vector.extract_strided_slice %37 {offsets = [16, 0], sizes = [16, 16], strides = [1, 1]} : vector<32x16xf32> to vector<16x16xf32>
    %40 = arith.subf %38, %39 : vector<16x16xf32>
    %41 = vector.extract_strided_slice %37 {offsets = [0, 0], sizes = [16, 16], strides = [1, 1]} : vector<32x16xf32> to vector<16x16xf32>
    %42 = vector.extract_strided_slice %36 {offsets = [16, 0], sizes = [16, 16], strides = [1, 1]} : vector<32x16xf32> to vector<16x16xf32>
    %43 = arith.addf %41, %42 : vector<16x16xf32>
    %44 = arith.mulf %40, %5 : vector<16x16xf32>
    %45 = arith.subf %44, %7 : vector<16x16xf32>
    %46 = arith.mulf %45, %5 : vector<16x16xf32>
    %47 = arith.mulf %43, %5 : vector<16x16xf32>
    %48 = arith.subf %47, %9 : vector<16x16xf32>
    %49 = arith.mulf %48, %5 : vector<16x16xf32>
    %50 = tpu.concatenate %46, %49 in 1 : vector<16x16xf32>, vector<16x16xf32> -> vector<16x32xf32>
    %cst_42 = arith.constant dense<0.000000e+00> : vector<16x32xf32>
    %51 = tpu.matmul %15, %50, %cst_42 {dimension_numbers = #tpu.dot_dimension_numbers<[1], [0], [0], [1], [0, 0, 1, 1], [], []>} : vector<16x16xf32>, vector<16x32xf32>, vector<16x32xf32> -> vector<16x32xf32>
    %cst_43 = arith.constant dense<0.000000e+00> : vector<16x32xf32>
    %52 = tpu.matmul %17, %50, %cst_43 {dimension_numbers = #tpu.dot_dimension_numbers<[1], [0], [0], [1], [0, 0, 1, 1], [], []>} : vector<16x16xf32>, vector<16x32xf32>, vector<16x32xf32> -> vector<16x32xf32>
    %53 = vector.extract_strided_slice %51 {offsets = [0, 0], sizes = [16, 16], strides = [1, 1]} : vector<16x32xf32> to vector<16x16xf32>
    %54 = vector.extract_strided_slice %52 {offsets = [0, 16], sizes = [16, 16], strides = [1, 1]} : vector<16x32xf32> to vector<16x16xf32>
    %55 = arith.subf %53, %54 : vector<16x16xf32>
    %56 = vector.extract_strided_slice %51 {offsets = [0, 16], sizes = [16, 16], strides = [1, 1]} : vector<16x32xf32> to vector<16x16xf32>
    %57 = vector.extract_strided_slice %52 {offsets = [0, 0], sizes = [16, 16], strides = [1, 1]} : vector<16x32xf32> to vector<16x16xf32>
    %58 = arith.addf %56, %57 : vector<16x16xf32>
    %59 = tpu.concatenate %55, %58 in 0 : vector<16x16xf32>, vector<16x16xf32> -> vector<32x16xf32>
    %cst_44 = arith.constant dense<0.000000e+00> : vector<32x16xf32>
    %60 = tpu.matmul %59, %23, %cst_44 {dimension_numbers = #tpu.dot_dimension_numbers<[1], [0], [0], [1], [0, 0, 1, 1], [], []>} : vector<32x16xf32>, vector<16x16xf32>, vector<32x16xf32> -> vector<32x16xf32>
    %cst_45 = arith.constant dense<0.000000e+00> : vector<32x16xf32>
    %61 = tpu.matmul %59, %25, %cst_45 {dimension_numbers = #tpu.dot_dimension_numbers<[1], [0], [0], [1], [0, 0, 1, 1], [], []>} : vector<32x16xf32>, vector<16x16xf32>, vector<32x16xf32> -> vector<32x16xf32>
    %62 = vector.extract_strided_slice %60 {offsets = [0, 0], sizes = [16, 16], strides = [1, 1]} : vector<32x16xf32> to vector<16x16xf32>
    %63 = vector.extract_strided_slice %61 {offsets = [16, 0], sizes = [16, 16], strides = [1, 1]} : vector<32x16xf32> to vector<16x16xf32>
    %64 = arith.subf %62, %63 : vector<16x16xf32>
    %65 = vector.extract_strided_slice %61 {offsets = [0, 0], sizes = [16, 16], strides = [1, 1]} : vector<32x16xf32> to vector<16x16xf32>
    %66 = vector.extract_strided_slice %60 {offsets = [16, 0], sizes = [16, 16], strides = [1, 1]} : vector<32x16xf32> to vector<16x16xf32>
    %67 = arith.addf %65, %66 : vector<16x16xf32>
    %c0_46 = arith.constant 0 : index
    %c0_47 = arith.constant 0 : index
    %c0_48 = arith.constant 0 : index
    %c0_49 = arith.constant 0 : index
    %68 = vector.load %arg6[%c0_46, %c0_47, %c0_48, %c0_49] : memref<1x2x16x16xf32, #tpu.memory_space<vmem>>, vector<1x1x16x16xf32>
    %69 = vector.shape_cast %68 : vector<1x1x16x16xf32> to vector<16x16xf32>
    %70 = vector.shape_cast %64 : vector<16x16xf32> to vector<1x1x16x16xf32>
    tpu.vector_store %arg6[%c0_46, %c0_47, %c0_48, %c0_49], %70 {strides = array<i32>} : memref<1x2x16x16xf32, #tpu.memory_space<vmem>>, vector<1x1x16x16xf32>,
    %c0_50 = arith.constant 0 : index
    %c1_51 = arith.constant 1 : index
    %c0_52 = arith.constant 0 : index
    %c0_53 = arith.constant 0 : index
    %71 = vector.load %arg6[%c0_50, %c1_51, %c0_52, %c0_53] : memref<1x2x16x16xf32, #tpu.memory_space<vmem>>, vector<1x1x16x16xf32>
    %72 = vector.shape_cast %71 : vector<1x1x16x16xf32> to vector<16x16xf32>
    %73 = vector.shape_cast %67 : vector<16x16xf32> to vector<1x1x16x16xf32>
    tpu.vector_store %arg6[%c0_50, %c1_51, %c0_52, %c0_53], %73 {strides = array<i32>} : memref<1x2x16x16xf32, #tpu.memory_space<vmem>>, vector<1x1x16x16xf32>,
    %cst_54 = arith.constant 5.000000e-01 : f32
    %74 = vector.broadcast %cst_54 : f32 to vector<16x16xf32>
    %75 = arith.mulf %74, %64 : vector<16x16xf32>
    %76 = arith.subf %1, %75 : vector<16x16xf32>
    %c0_55 = arith.constant 0 : index
    %c0_56 = arith.constant 0 : index
    %c0_57 = arith.constant 0 : index
    %c0_58 = arith.constant 0 : index
    %77 = vector.load %arg7[%c0_55, %c0_56, %c0_57, %c0_58] : memref<1x2x16x16xf32, #tpu.memory_space<vmem>>, vector<1x1x16x16xf32>
    %78 = vector.shape_cast %77 : vector<1x1x16x16xf32> to vector<16x16xf32>
    %79 = vector.shape_cast %76 : vector<16x16xf32> to vector<1x1x16x16xf32>
    tpu.vector_store %arg7[%c0_55, %c0_56, %c0_57, %c0_58], %79 {strides = array<i32>} : memref<1x2x16x16xf32, #tpu.memory_space<vmem>>, vector<1x1x16x16xf32>,
    %cst_59 = arith.constant 5.000000e-01 : f32
    %80 = vector.broadcast %cst_59 : f32 to vector<16x16xf32>
    %81 = arith.mulf %80, %67 : vector<16x16xf32>
    %82 = arith.subf %3, %81 : vector<16x16xf32>
    %c0_60 = arith.constant 0 : index
    %c1_61 = arith.constant 1 : index
    %c0_62 = arith.constant 0 : index
    %c0_63 = arith.constant 0 : index
    %83 = vector.load %arg7[%c0_60, %c1_61, %c0_62, %c0_63] : memref<1x2x16x16xf32, #tpu.memory_space<vmem>>, vector<1x1x16x16xf32>
    %84 = vector.shape_cast %83 : vector<1x1x16x16xf32> to vector<16x16xf32>
    %85 = vector.shape_cast %82 : vector<16x16xf32> to vector<1x1x16x16xf32>
    tpu.vector_store %arg7[%c0_60, %c1_61, %c0_62, %c0_63], %85 {strides = array<i32>} : memref<1x2x16x16xf32, #tpu.memory_space<vmem>>, vector<1x1x16x16xf32>,
    return
  }
  func.func @transform_0(%arg0: i32) -> (i32, i32, i32, i32) {
    %c0_i32 = arith.constant 0 : i32
    %c0_i32_0 = arith.constant 0 : i32
    %c0_i32_1 = arith.constant 0 : i32
    %c0_i32_2 = arith.constant 0 : i32
    return %arg0, %c0_i32, %c0_i32_0, %c0_i32_1 : i32, i32, i32, i32
  }
  func.func @transform_1(%arg0: i32) -> (i32, i32, i32) {
    %c0_i32 = arith.constant 0 : i32
    %c0_i32_0 = arith.constant 0 : i32
    %c0_i32_1 = arith.constant 0 : i32
    return %arg0, %c0_i32, %c0_i32_0 : i32, i32, i32
  }
  func.func @transform_2(%arg0: i32) -> (i32, i32, i32, i32) {
    %c0_i32 = arith.constant 0 : i32
    %c0_i32_0 = arith.constant 0 : i32
    %c0_i32_1 = arith.constant 0 : i32
    %c0_i32_2 = arith.constant 0 : i32
    return %arg0, %c0_i32, %c0_i32_0, %c0_i32_1 : i32, i32, i32, i32
  }
  func.func @transform_3(%arg0: i32) -> (i32, i32, i32) {
    %c0_i32 = arith.constant 0 : i32
    %c0_i32_0 = arith.constant 0 : i32
    %c0_i32_1 = arith.constant 0 : i32
    %c0_i32_2 = arith.constant 0 : i32
    return %c0_i32, %c0_i32_0, %c0_i32_1 : i32, i32, i32
  }
  func.func @transform_4(%arg0: i32) -> (i32, i32, i32) {
    %c0_i32 = arith.constant 0 : i32
    %c0_i32_0 = arith.constant 0 : i32
    %c0_i32_1 = arith.constant 0 : i32
    %c0_i32_2 = arith.constant 0 : i32
    return %c0_i32, %c0_i32_0, %c0_i32_1 : i32, i32, i32
  }
  func.func @transform_5(%arg0: i32) -> (i32, i32, i32, i32) {
    %c0_i32 = arith.constant 0 : i32
    %c0_i32_0 = arith.constant 0 : i32
    %c0_i32_1 = arith.constant 0 : i32
    %c0_i32_2 = arith.constant 0 : i32
    return %arg0, %c0_i32, %c0_i32_0, %c0_i32_1 : i32, i32, i32, i32
  }
  func.func @transform_6(%arg0: i32) -> (i32, i32, i32, i32) {
    %c0_i32 = arith.constant 0 : i32
    %c0_i32_0 = arith.constant 0 : i32
    %c0_i32_1 = arith.constant 0 : i32
    %c0_i32_2 = arith.constant 0 : i32
    return %arg0, %c0_i32, %c0_i32_0, %c0_i32_1 : i32, i32, i32, i32
  }
}

</mosaic_0001>

<bundles_post_ra>
// kernel: tpu_custom_call.1
= control target key start
LH: loop header
LB: loop body
LE: loop exit
PB: predicated region body
PF: predicated region fallthrough
CT: control target
= control target key end

     0   :  { %s2480_s0 = inlined_call_operand.hbm [shape: f32[2,2,16,16], index: 0, kind: input, shape index: {}]   ;;  %s2481_s1 = inlined_call_operand.hbm [shape: f32[2,16,16], index: 1, kind: input, shape index: {}]   ;;  %s2482_s2 = inlined_call_operand.hbm [shape: f32[2,2,16,16], index: 2, kind: input, shape index: {}]   ;;  %s2483_s3 = inlined_call_operand.hbm [shape: f32[4,16,16], index: 3, kind: input, shape index: {}]   ;;  %s2484_s4 = inlined_call_operand.hbm [shape: f32[4,16,16], index: 4, kind: input, shape index: {}]   ;;  %s2485_s5 = inlined_call_operand.hbm [shape: f32[2,2,16,16], index: 5, kind: output, shape index: {0}]   ;;  %s2486_s6 = inlined_call_operand.hbm [shape: f32[2,2,16,16], index: 6, kind: output, shape index: {1}]  }
   0x1   :  { %2504 = sst [smem:[#allocation23_spill]] %s2481_s1 }
   0x2   :  { %2505 = sst [smem:[#allocation24_spill]] %s2483_s3 }
   0x3   :  { %12 = vsyncpa [#allocation3], 0 }
   0x4   :  { %14 = vsyncpa [#allocation3 + $0x1], 0 }
   0x5   :  { %15 = vsyncpa [#allocation6], 0 }
   0x6   :  { %17 = vsyncpa [#allocation6 + $0x1], 0 }
   0x7   :  { %18 = vsyncpa [#allocation9], 0 }
   0x8   :  { %19 = vsyncpa [#allocation4], 0 }
   0x9   :  { %21 = vsyncpa [#allocation4 + $0x1], 0 }
   0xa   :  { %22 = vsyncpa [#allocation13], 0 }
   0xb   :  { %24 = vsyncpa [#allocation13 + $0x1], 0  ;;  %s2025_s21 = smov 0   ;;  %s2027_s22 = smov 0  }
   0xc   :  { %s2029_s23 = smov 0   ;;  %s2031_s24 = smov 0  }
   0xd LB: > { %2506 = sst [smem:[#allocation19_spill]] %s1971_s23  ;;  %s2046_s25 = sadd.s32 4294967295, %s1975_s24   ;;  %s1975_s24 = sphi %s2031_s24, %s2536_s24   ;;  %s1971_s23 = sphi %s2029_s23, %s2538_s23   ;;  %s1967_s22 = sphi %s2027_s22, %s2540_s22   ;;  %s1963_s21 = sphi %s2025_s21, %s2539_s21  }
   0xe   : > { %s1414_s26 = sadd.s32 4294967294, %s1975_s24   ;;  %s2050_s27 = sadd.s32 1, %s1975_s24  }
   0xf   : > { %2507 = sst [smem:[#allocation20_spill]] %s2050_s27  ;;  %s37_s28 = sadd.s32 1, %s1971_s23 }
  0x10   : > { %s34_s29 = ssub.s32 %s1975_s24, %s2050_s27  ;;  %p44_p0 = scmp.ne.s32.totalorder %s1971_s23, %s1967_s22 }
  0x11   : > { %p35_p1 = scmp.eq.s32.totalorder %s34_s29, 0  ;;  %p45_p2 = scmp.eq.s32.totalorder %s1975_s24, 0 }
  0x12   : > { %p50_p3 = scmp.ne.s32.totalorder %s1967_s22, %s1963_s21  ;;  %p2487_p4 = scmp.eq.s32.totalorder %s2046_s25, 0 }
  0x13   : > { %s2062_s30 = scalar_select %p35_p1, %s1971_s23, %s37_s28  }
  0x14   : > { %p2064_p5 = por %p45_p2, %p44_p0  ;;  %p2070_p6 = por %p2487_p4, %p50_p3 }
  0x15   : > { %2508 = sst [smem:[#allocation21_spill]] %s2062_s30  ;;  %p168_p7 = scmp.eq.s32.totalorder %s2046_s25, 1 }
  0x16   : > { %s2509_s7 = scalar_select %p2064_p5, 1, 0 }
  0x17   : > { %s2510_s8 = scalar_select %p2070_p6, 1, 0 }
  0x18   : > { %p174_p8 = scmp.eq.s32.totalorder %s1414_s26, 1  ;;  %p1415_p9 = scmp.ge.s32.totalorder %s1975_s24, 1 }
  0x19   : > { %p207_p10 = scmp.lt.s32.totalorder %s1975_s24, 3  ;;  %p2077_p11 = por %p168_p7, %p44_p0 }
  0x1a   : > { %p2081_p12 = por %p174_p8, %p50_p3  ;;  %s1977_s12 = smov [#allocation8]  }
  0x1b   : > { %s2511_s9 = scalar_select %p2077_p11, 1, 0 }
  0x1c   : > { %s2512_s10 = scalar_select %p2081_p12, 1, 0 }
  0x1d   : > { %p2085_p13 = pnand %p1415_p9, %p207_p10  ;;  %s219_s13 = sshll.u32 %s1977_s12, 4  ;;  %s220_s13 = int_to_ptr.vmem [resolvable:$true] %s219_s13 }
  0x1e   : > { %2513 = sst [smem:[#allocation22_spill]] %s2512_s10  ;;  %s2100_s15 = sand.u32 1, %s1971_s23  }
  0x1f   : > { %s2514_s11 = scalar_select %p2085_p13, 1, 0 }
  0x20   : > { %p1643_p1 = pneg %p2085_p13  ;;  %s267_s16 = sand.u32 1, %s1975_s24  }
  0x21   : > { %s2516_s3 = sld [smem:[#allocation24_spill]] }
  0x22   : > { %p2093_p2 = pnand %p1643_p1, %p2487_p4 }
  0x24   : > { %s2515_s14 = scalar_select %p2093_p2, 1, 0 }
  0x25   : > { %p2494_p8 = pneg %p2093_p2 }
  0x27   : > { %s1723_s19 = scalar_lea.hbm %s2516_s3, 1024 }
  0x28   : > { %p1724_p7 = scmp.ne.s32.totalorder %s2516_s3, %s1723_s19  ;;  %p1730_p1 = scmp.lt.u32.totalorder %s1723_s19, %s2516_s3 }
  0x2a   : > { %p1726_p9 = pnand %p2494_p8, %p1724_p7 }
  0x2c   : > { %p1727_p10 = pneg %p1726_p9 }
  0x2e   : > { %p1732_p0 = pnand %p1730_p1, %p1727_p10 }
  0x30   : > { %1735 = shalt.err (!%p1732_p0)
}
  0x31   : > { %s1736_s12 = scalar_lea.vmem %s220_s13, 1024  ;;  %p1744_p11 = scmp.lt.s32.totalorder %s220_s13, %s220_s13 }
  0x32   : > { %p1737_p4 = scmp.ne.s32.totalorder %s220_s13, %s1736_s12  ;;  %p1745_p6 = scmp.lt.s32.totalorder %s1736_s12, %s1736_s12 }
  0x34   : > { %p1739_p3 = pnand %p1737_p4, %p2494_p8  ;;  %p1746_p13 = por %p1745_p6, %p1744_p11 }
  0x36   : > { %p1740_p12 = pneg %p1739_p3 }
  0x38   : > { %p1747_p5 = pnand %p1746_p13, %p1740_p12 }
  0x3a   : > { %1750 = shalt.err (!%p1747_p5)
}
  0x3b   : > { %s2492_s17 = smov 128   ;;  %s1979_s18 = smov 8  }
  0x3c   : > { %1646 = dma.hbm_to_vmem [thread:$0]  (!%p2093_p2), %s2516_s3, 1024, %s220_s13, [#allocation9], %s2492_s17, %s2492_s17, %s1979_s18  }
  0x3d   : > { %p2517_p4 = scmp.ne.s32.totalorder %s2509_s7, 0  ;;  %p2518_p0 = scmp.lt.s32.totalorder %s1975_s24, 2 }
  0x3e   : > { %s1422_s28 = sshll.u32 %s2100_s15, 4  ;;  %s1477_s29 = sshll.u32 %s1975_s24, 8 }
  0x3f   : > { %p2132_p6 = pnand %p2518_p0, %p2517_p4  ;;  %s2520_s1 = sld [smem:[#allocation23_spill]] }
  0x40   : > { %s271_s19 = scalar_lea.vmem [#allocation5], %s1422_s28  ;;  %s2145_s7 = scalar_lea.sflag [#allocation6], %s267_s16 }
  0x41   : > { %s2519_s26 = scalar_select %p2132_p6, 1, 0 }
  0x42   : > { %s278_s13 = sshll.u32 %s271_s19, 4  ;;  %p2151_p11 = pneg %p2132_p6  ;;  %s2143_s13 = int_to_ptr.vmem [resolvable:$true] %s278_s13 }
  0x44   : > { %s2521_s17 = scalar_select %p2151_p11, 1, 0 }
  0x45   : > { %s2141_s23 = scalar_lea.hbm %s2520_s1, %s1477_s29  ;;  %s1756_s28 = scalar_lea.hbm %s2520_s1, 512 }
  0x46   : > { %s1751_s20 = scalar_lea.hbm %s2141_s23, 256  ;;  %p1757_p3 = scmp.lt.u32.totalorder %s2141_s23, %s2520_s1 }
  0x47   : > { %p1752_p5 = scmp.ne.s32.totalorder %s2141_s23, %s1751_s20  ;;  %p1758_p7 = scmp.lt.u32.totalorder %s1756_s28, %s1751_s20 }
  0x48   : > { %p1760_p10 = scmp.lt.u32.totalorder %s1751_s20, %s2141_s23 }
  0x49   : > { %p1754_p12 = pnand %p2151_p11, %p1752_p5  ;;  %p1759_p9 = por %p1758_p7, %p1757_p3 }
  0x4b   : > { %p1755_p13 = pneg %p1754_p12  ;;  %p1761_p1 = por %p1760_p10, %p1759_p9 }
  0x4d   : > { %p1762_p4 = pnand %p1761_p1, %p1755_p13 }
  0x4f   : > { %1765 = shalt.err (!%p1762_p4)
}
  0x50   : > { %s1766_s16 = scalar_lea.vmem %s2143_s13, 256  ;;  %s1980_s30 = smov [#allocation5]  }
  0x51   : > { %p1767_p0 = scmp.ne.s32.totalorder %s2143_s13, %s1766_s16  ;;  %s1771_s29 = sshll.u32 %s1980_s30, 4  ;;  %s1772_s29 = int_to_ptr.vmem [resolvable:$false] %s1771_s29 }
  0x52   : > { %s1773_s12 = scalar_lea.vmem %s1772_s29, 512  ;;  %p1774_p8 = scmp.lt.s32.totalorder %s2143_s13, %s1772_s29 }
  0x53   : > { %p1769_p5 = pnand %p1767_p0, %p2151_p11  ;;  %p1775_p2 = scmp.lt.s32.totalorder %s1773_s12, %s1766_s16 }
  0x55   : > { %p1770_p12 = pneg %p1769_p5  ;;  %p1776_p3 = por %p1775_p2, %p1774_p8 }
  0x57   : > { %p1777_p7 = pnand %p1776_p3, %p1770_p12 }
  0x59   : > { %1780 = shalt.err (!%p1777_p7)
}
  0x5a   : > { %s2522_s20 = smov 128   ;;  %s1981_s28 = smov [#allocation10]  }
  0x5b   : > { %1656 = dma.hbm_to_vmem [thread:$0]  (!%p2132_p6), %s2141_s23, 256, %s2143_s13, %s2145_s7, %s2522_s20, %s2522_s20, %s1979_s18  }
  0x5c   : > { %s232_s19 = sshll.u32 %s1981_s28, 4  ;;  %s1419_s30 = sshll.u32 %s2100_s15, 5  ;;  %s233_s19 = int_to_ptr.vmem [resolvable:$true] %s232_s19 }
  0x5d   : > { %s1781_s12 = scalar_lea.hbm %s2484_s4, 1024  ;;  %p2523_p8 = scmp.ne.s32.totalorder %s2515_s14, 0 }
  0x5e   : > { %p1782_p2 = scmp.ne.s32.totalorder %s2484_s4, %s1781_s12  ;;  %p1788_p1 = scmp.lt.u32.totalorder %s1781_s12, %s2484_s4 }
  0x5f   : > { %p2524_p13 = pneg %p2523_p8 }
  0x61   : > { %p1784_p9 = pnand %p1782_p2, %p2524_p13 }
  0x63   : > { %p1785_p10 = pneg %p1784_p9 }
  0x65   : > { %p1790_p4 = pnand %p1788_p1, %p1785_p10 }
  0x67   : > { %1793 = shalt.err (!%p1790_p4)
}
  0x68   : > { %s1794_s23 = scalar_lea.vmem %s233_s19, 1024  ;;  %p2525_p5 = pmov %p2524_p13 }
  0x69   : > { %p1795_p0 = scmp.ne.s32.totalorder %s233_s19, %s1794_s23  ;;  %p1802_p7 = scmp.lt.s32.totalorder %s233_s19, %s233_s19 }
  0x6a   : > { %p1803_p6 = scmp.lt.s32.totalorder %s1794_s23, %s1794_s23 }
  0x6b   : > { %p1797_p12 = pnand %p1795_p0, %p2525_p5 }
  0x6c   : > { %p1804_p11 = por %p1803_p6, %p1802_p7 }
  0x6d   : > { %p1798_p3 = pneg %p1797_p12 }
  0x6f   : > { %p1805_p2 = pnand %p1804_p11, %p1798_p3 }
  0x71   : > { %1808 = shalt.err (!%p1805_p2)
}
  0x72   : > { %1649 = dma.hbm_to_vmem [thread:$0]  (!%p2523_p8), %s2484_s4, 1024, %s233_s19, [#allocation9], %s2522_s20, %s2522_s20, %s1979_s18  }
  0x73   : > { %s1476_s27 = sshll.u32 %s1975_s24, 9  ;;  %s250_s14 = scalar_lea.vmem [#allocation2], %s1419_s30 }
  0x74   : > { %s2208_s28 = scalar_lea.hbm %s2480_s0, %s1476_s27  ;;  %s257_s29 = sshll.u32 %s250_s14, 4  ;;  %s2212_s29 = int_to_ptr.vmem [resolvable:$true] %s257_s29 }
  0x75   : > { %s247_s16 = scalar_lea.sflag [#allocation3], %s2100_s15  ;;  %s1809_s12 = scalar_lea.hbm %s2208_s28, 512 }
  0x76   : > { %p1810_p6 = scmp.ne.s32.totalorder %s2208_s28, %s1809_s12  ;;  %p2526_p11 = scmp.ne.s32.totalorder %s2521_s17, 0 }
  0x77   : > { %s1814_s1 = scalar_lea.hbm %s2480_s0, 1024  ;;  %p1815_p9 = scmp.lt.u32.totalorder %s2208_s28, %s2480_s0 }
  0x78   : > { %p1812_p8 = pnand %p1810_p6, %p2526_p11  ;;  %p1816_p10 = scmp.lt.u32.totalorder %s1814_s1, %s1809_s12 }
  0x79   : > { %p1818_p4 = scmp.lt.u32.totalorder %s1809_s12, %s2208_s28 }
  0x7a   : > { %p1813_p13 = pneg %p1812_p8  ;;  %p1817_p1 = por %p1816_p10, %p1815_p9 }
  0x7c   : > { %p1819_p0 = por %p1818_p4, %p1817_p1 }
  0x7e   : > { %p1820_p5 = pnand %p1819_p0, %p1813_p13 }
  0x80   : > { %1823 = shalt.err (!%p1820_p5)
}
  0x81   : > { %s1824_s13 = scalar_lea.vmem %s2212_s29, 512  ;;  %s1982_s14 = smov [#allocation2]  }
  0x82   : > { %p1825_p12 = scmp.ne.s32.totalorder %s2212_s29, %s1824_s13  ;;  %s1829_s19 = sshll.u32 %s1982_s14, 4  ;;  %s1830_s19 = int_to_ptr.vmem [resolvable:$false] %s1829_s19 }
  0x83   : > { %s1831_s23 = scalar_lea.vmem %s1830_s19, 1024  ;;  %p1832_p2 = scmp.lt.s32.totalorder %s2212_s29, %s1830_s19 }
  0x84   : > { %p1827_p3 = pnand %p1825_p12, %p2526_p11  ;;  %p1833_p6 = scmp.lt.s32.totalorder %s1831_s23, %s1824_s13 }
  0x86   : > { %p1828_p7 = pneg %p1827_p3  ;;  %p1834_p8 = por %p1833_p6, %p1832_p2 }
  0x88   : > { %p1835_p9 = pnand %p1834_p8, %p1828_p7 }
  0x8a   : > { %1838 = shalt.err (!%p1835_p9)
}
  0x8b   : > { %p2527_p13 = scmp.ne.s32.totalorder %s2519_s26, 0  ;;  %s2246_s3 = scalar_lea.hbm %s2482_s2, %s1476_s27 }
  0x8c   : > { %s292_s10 = scalar_lea.vmem [#allocation7], %s1419_s30  ;;  %s1839_s14 = scalar_lea.hbm %s2246_s3, 512 }
  0x8d   : > { %1653 = dma.hbm_to_vmem [thread:$0]  (!%p2527_p13), %s2208_s28, 512, %s2212_s29, %s247_s16, %s2522_s20, %s2522_s20, %s1979_s18  }
  0x8e   : > { %s299_s13 = sshll.u32 %s292_s10, 4  ;;  %p1840_p10 = scmp.ne.s32.totalorder %s2246_s3, %s1839_s14  ;;  %s2250_s13 = int_to_ptr.vmem [resolvable:$true] %s299_s13 }
  0x8f   : > { %s1844_s16 = scalar_lea.hbm %s2482_s2, 1024  ;;  %p1845_p0 = scmp.lt.u32.totalorder %s2246_s3, %s2482_s2 }
  0x90   : > { %p1842_p1 = pnand %p1840_p10, %p2526_p11  ;;  %p1846_p5 = scmp.lt.u32.totalorder %s1844_s16, %s1839_s14 }
  0x91   : > { %p1848_p3 = scmp.lt.u32.totalorder %s1839_s14, %s2246_s3 }
  0x92   : > { %p1843_p4 = pneg %p1842_p1  ;;  %p1847_p12 = por %p1846_p5, %p1845_p0 }
  0x94   : > { %p1849_p7 = por %p1848_p3, %p1847_p12 }
  0x96   : > { %p1850_p2 = pnand %p1849_p7, %p1843_p4 }
  0x98   : > { %1853 = shalt.err (!%p1850_p2)
}
  0x99   : > { %s1854_s15 = scalar_lea.vmem %s2250_s13, 512  ;;  %s1983_s30 = smov [#allocation7]  }
  0x9a   : > { %p1855_p6 = scmp.ne.s32.totalorder %s2250_s13, %s1854_s15  ;;  %s1859_s23 = sshll.u32 %s1983_s30, 4  ;;  %s1860_s23 = int_to_ptr.vmem [resolvable:$false] %s1859_s23 }
  0x9b   : > { %s1861_s12 = scalar_lea.vmem %s1860_s23, 1024  ;;  %p1862_p10 = scmp.lt.s32.totalorder %s2250_s13, %s1860_s23 }
  0x9c   : > { %p1857_p8 = pnand %p1855_p6, %p2526_p11  ;;  %p1863_p1 = scmp.lt.s32.totalorder %s1861_s12, %s1854_s15 }
  0x9e   : > { %p1858_p9 = pneg %p1857_p8  ;;  %p1864_p0 = por %p1863_p1, %p1862_p10 }
  0xa0   : > { %p1865_p5 = pnand %p1864_p0, %p1858_p9 }
  0xa2   : > { %1868 = shalt.err (!%p1865_p5)
}
  0xa3   : > { %1659 = dma.hbm_to_vmem [thread:$0]  (!%p2527_p13), %s2246_s3, 512, %s2250_s13, %s2145_s7, %s2522_s20, %s2522_s20, %s1979_s18  }
  0xa4   : > { %p2528_p11 = scmp.ne.s32.totalorder %s2514_s11, 0 }
  0xa5   : > { %s2280_s17 = sand.u32 (!%p2528_p11), 1, %s1967_s22   ;;  %p2529_p4 = scmp.ne.s32.totalorder (!%p2528_p11), %s2510_s8, 0 }
  0xa6   : > { %311 = sbr.rel (%p2528_p11) target bundleno = 1826 (0x722), region = 40  ;;  %s2283_s1 = sshll.u32 (!%p2528_p11), %s2280_s17, 5 }
  0xa7   : > { %s314_s26 = scalar_lea.sflag (!%p2528_p11), [#allocation3], %s2280_s17  ;;  %s317_s10 = scalar_lea.vmem (!%p2528_p11), [#allocation2], %s2283_s1 }
  0xad   : > { %1942 = dma.done.wait (%p2529_p4), %s314_s26, 512  }
  0xae   : > { %1944 = vsyncadd (%p2529_p4), %s314_s26, 4294966784  ;;  %s322_s11 = sand.u32 1, %s2046_s25   ;;  %s1430_s18 = sshll.u32 %s2280_s17, 4 }
  0xaf   : > { %s323_s7 = scalar_lea.sflag [#allocation6], %s322_s11  ;;  %s2293_s20 = scalar_lea.vmem [#allocation5], %s1430_s18 }
  0xb0   : > { %1946 = dma.done.wait (%p2529_p4), %s323_s7, 768  }
  0xb1   : > { %1948 = vsyncadd (%p2529_p4), %s323_s7, 4294966528  ;;  %s2300_s3 = scalar_lea.vmem [#allocation7], %s2283_s1  ;;  %p2530_p13 = scmp.eq.s32.totalorder %s2046_s25, 0 }
  0xb3   : > { %1950 = dma.done.wait (%p2530_p13), [#allocation9], 2048   ;;  %p2531_p12 = pmov %p2530_p13 }
  0xb4   : > { %v2306_v0 = vld [vmem:[%s317_s10 + $0x10] sm:$0xff]  ;;  %v2308_v1 = vld [vmem:[%s317_s10 + $0x18] sm:$0xff]  ;;  %vm429_vm0 = vcmask 130048   ;;  %v399_v3 = vld [vmem:[#allocation8] sm:$0xff]  ;;  %s1984_s8 = smov 16   ;;  %s1985_s13 = smov 112  }
  0xb5   : > { %1952 = vsyncadd (%p2531_p12), [#allocation9], 4294965248  ;;  %v1713_v2 = vpack.i.bf16 %v2308_v1, %v2306_v0  ;;  %1525 = vmatprep.mubr.msk.f32.mxu0 %vm429_vm0, %v399_v3  ;;  %v2314_v5 = vld [vmem:[%s317_s10] sm:$0xff]  ;;  %v2316_v6 = vld [vmem:[%s317_s10 + $0x8] sm:$0xff]  ;;  %s379_s14 = scalar_lea.vmem [#allocation11], %s2283_s1  ;;  %s1479_s29 = sshll.u32 %s2046_s25, 9 }
  0xb6   : > { %v400_v12 = vld [vmem:[#allocation8 + $0x8] sm:$0xff]  ;;  %v402_v13 = vld [vmem:[#allocation8 + $0x10] sm:$0xff]  ;;  %v403_v14 = vld [vmem:[#allocation8 + $0x18] sm:$0xff]  ;;  %s1231_s28 = sshll.u32 %s379_s14, 4  ;;  %s2375_s16 = scalar_lea.vmem [#allocation12], %s2283_s1  ;;  %s2371_s28 = int_to_ptr.vmem [resolvable:$true] %s1231_s28 }
  0xb7   : > { %1714 = vrot.lane.b32.xlu0 %v1713_v2, %s1984_s8  ;;  %v410_v15 = vld [vmem:[#allocation10] sm:$0xff]  ;;  %v411_v16 = vld [vmem:[#allocation10 + $0x8] sm:$0xff]  ;;  %v413_v18 = vld [vmem:[#allocation10 + $0x10] sm:$0xff]  ;;  %s2384_s15 = scalar_lea.hbm %s2485_s5, %s1479_s29  ;;  %s1247_s30 = sshll.u32 %s2375_s16, 4  ;;  %s2429_s30 = int_to_ptr.vmem [resolvable:$true] %s1247_s30 }
  0xb8   : > { %v1597_v17 = vpack.c.bf16 %v411_v16, %v410_v15  ;;  %v414_v19 = vld [vmem:[#allocation10 + $0x18] sm:$0xff]  ;;  %v392_v38 = vld [vmem:[%s2293_s20] sm:$0xff]  ;;  %v395_v53 = vld [vmem:[%s2300_s3 + $0x8] sm:$0xff]  ;;  %s1213_s23 = scalar_lea.sflag [#allocation4], %s2280_s17  ;;  %s1869_s12 = scalar_lea.vmem %s2371_s28, 512 }
  0xb9   : > { %v1601_v21 = vpack.c.bf16 %v414_v19, %v413_v18  ;;  %v393_v37 = vld [vmem:[%s2293_s20 + $0x8] sm:$0xff]  ;;  %v1438_v42 = vld [vmem:[%s2300_s3 + $0x10] sm:$0xff]  ;;  %v405_v48 = vld [vmem:[#allocation8 + $0x20] sm:$0xff]  ;;  %p1870_p3 = scmp.ne.s32.totalorder %s2371_s28, %s1869_s12  ;;  %p2532_p7 = scmp.ne.s32.totalorder %s2511_s9, 0 }
  0xba   : > { %v1439_v39 = vld [vmem:[%s2300_s3 + $0x18] sm:$0xff]  ;;  %1559 = vmatprep.mubr.msk.f32.mxu1 %vm429_vm0, %v405_v48  ;;  %v394_v56 = vld [vmem:[%s2300_s3] sm:$0xff]  ;;  %v419_v16 = vld [vmem:[#allocation10 + $0x30] sm:$0xff]  ;;  %s1986_s1 = smov [#allocation11]  }
  0xbb   : > { %p1871_p2 = pnand %p1870_p3, %p2532_p7  ;;  %s1873_s26 = sshll.u32 %s1986_s1, 4  ;;  %s1874_s26 = int_to_ptr.vmem [resolvable:$false] %s1873_s26 }
  0xbc   : > { %s1875_s10 = scalar_lea.vmem %s1874_s26, 1024  ;;  %p1876_p8 = scmp.lt.s32.totalorder %s2371_s28, %s1874_s26 }
  0xbd   : > { %p1872_p6 = pneg %p1871_p2  ;;  %p1877_p9 = scmp.lt.s32.totalorder %s1875_s10, %s1869_s12 }
  0xbf   : > { %p1878_p10 = por %p1877_p9, %p1876_p8 }
  0xc1   : > { %p1879_p1 = pnand %p1878_p10, %p1872_p6 }
 0x129   : > { %v1715_v4 = vpop.permute.xlu0 %1714 }
 0x12a   : > { %v1717_v7 = vunpack.i.h.bf16 %v1715_v4  ;;  %v1716_v8 = vunpack.i.l.bf16 %v1715_v4 }
 0x12c   : > { %v430_v9 = vsel %vm429_vm0, %v2314_v5, %v1716_v8  ;;  %v431_v10 = vsel %vm429_vm0, %v2316_v6, %v1717_v7 }
 0x12d   : > { %v1589_v11 = vpack.c.bf16 %v431_v10, %v430_v9  ;;  %v406_v9 = vld [vmem:[#allocation8 + $0x28] sm:$0xff]  ;;  %v408_v10 = vld [vmem:[#allocation8 + $0x30] sm:$0xff] }
 0x12f   : > { %1590 = vmatprep.subr.bf16.mxu0 %v1589_v11 }
 0x130   : > { %1592 = vmatpush3.bf16.msra.mxu0 %v1589_v11 }
 0x131   : > { %1594 = vmatprep.subr.bf16.mxu0 %v1589_v11 }
 0x133   : > { %1526 = vmatmul.mubr.msk.f32.vlgmr.msra.gmra.mrb[0].mxu0 %vm429_vm0, %v400_v12  ;;  %v416_v12 = vld [vmem:[#allocation10 + $0x20] sm:$0xff] }
 0x134   : > { %1596 = vmatpush3.bf16.msra.mxu0 %v1589_v11  ;;  %1532 = vmatprep.mubr.msk.f32.mxu0 %vm429_vm0, %v402_v13  ;;  %v409_v11 = vld [vmem:[#allocation8 + $0x38] sm:$0xff]  ;;  %v417_v13 = vld [vmem:[#allocation10 + $0x28] sm:$0xff] }
 0x135   : > { %1598 = vmatprep.subr.bf16.mxu0 %v1597_v17 }
 0x137   : > { %1533 = vmatmul.mubr.msk.f32.vlgmr.msra.gmra.mrb[2].mxu0 %vm429_vm0, %v403_v14  ;;  %v1613_v14 = vpack.c.bf16 %v417_v13, %v416_v12 }
 0x138   : > { %1600 = vmatpush3.bf16.msra.mxu0 %v1597_v17  ;;  %v420_v17 = vld [vmem:[#allocation10 + $0x38] sm:$0xff] }
 0x139   : > { %1602 = vmatprep.subr.bf16.mxu0 %v1601_v21  ;;  %v1617_v19 = vpack.c.bf16 %v420_v17, %v419_v16 }
 0x206   : > { %v1527_v20 = vpop.f32.mrb[0].mxu0 }
 0x207   : > { %v504_v22 = vpop.f32.mrb[1].mxu0 }
 0x20a   : > { %v1534_v23 = vpop.f32.mrb[2].mxu0 }
 0x20b   : > { %606 = vrot.lane.b32.xlu1 %v1534_v23, %s1984_s8  ;;  %v585_v24 = vpop.f32.mrb[3].mxu0 }
 0x20c   : > { %604 = vrot.lane.b32.xlu0 %v585_v24, %s1984_s8 }
 0x20f   : > { %596 = vrot.lane.b32.xlu1 %v585_v24, %s1985_s13 }
 0x210   : > { %598 = vrot.lane.b32.xlu0 %v1534_v23, %s1985_s13 }
 0x27d   : > { %v607_v25 = vpop.permute.xlu1 %606 }
 0x27e   : > { %v611_v26 = vadd.f32 %v1527_v20, %v607_v25  ;;  %v605_v27 = vpop.permute.xlu0 %604 }
 0x27f   : > { %v610_v28 = vadd.f32 %v605_v27, %v504_v22 }
 0x280   : > { %616 = vrot.lane.b32.xlu0 %v611_v26, %s1985_s13 }
 0x281   : > { %v597_v29 = vpop.permute.xlu1 %596  ;;  %614 = vrot.lane.b32.xlu1 %v610_v28, %s1985_s13 }
 0x282   : > { %v602_v30 = vsub.f32 %v504_v22, %v597_v29  ;;  %v599_v31 = vpop.permute.xlu0 %598 }
 0x283   : > { %v603_v32 = vsub.f32 %v1527_v20, %v599_v31 }
 0x284   : > { %1539 = vmatprep.mubr.msk.f32.mxu0 %vm429_vm0, %v602_v30 }
 0x285   : > { %1540 = vmatmul.mubr.msk.f32.vlgmr.msra.gmra.mrb[4].mxu0 %vm429_vm0, %v603_v32 }
 0x286   : > { %1604 = vmatpush3.bf16.msra.mxu0 %v1601_v21 }
 0x2f2   : > { %v617_v34 = vpop.permute.xlu0 %616 }
 0x2f3   : > { %v615_v33 = vpop.permute.xlu1 %614 }
 0x2f4   : > { %1542 = vmatprep.mubr.msk.f32.mxu0 %vm429_vm0, %v615_v33 }
 0x2f5   : > { %1543 = vmatmul.mubr.msk.f32.gmra.mrb[6].mxu0 %vm429_vm0, %v617_v34 }
 0x2f6   : > { %1549 = vmatprep.mubr.msk.f32.mxu0 %vm429_vm0, %v602_v30 }
 0x2fd   : > { %1550 = vmatmul.mubr.msk.f32.vlgmr.msra.gmra.mrb[6].mxu0 %vm429_vm0, %v603_v32 }
 0x2fe   : > { %1552 = vmatprep.mubr.msk.f32.mxu0 %vm429_vm0, %v615_v33 }
 0x301   : > { %1553 = vmatmul.mubr.msk.f32.gmra.mrb[8].mxu0 %vm429_vm0, %v617_v34 }
 0x358   : > { %v1541_v35 = vpop.f32.mrb[4].mxu0 }
 0x359   : > { %v694_v36 = vpop.f32.mrb[5].mxu0 }
 0x3d0   : > { %v1551_v40 = vpop.f32.mrb[6].mxu0 }
 0x3d1   : > { %v809_v41 = vmul.f32 %v1551_v40, %v393_v37  ;;  %v779_v43 = vpop.f32.mrb[7].mxu0 }
 0x3d2   : > { %v808_v44 = vmul.f32 %v779_v43, %v392_v38 }
 0x3d3   : > { %v811_v45 = vsub.f32 %v809_v41, %v1439_v39 }
 0x3d4   : > { %v810_v46 = vsub.f32 %v808_v44, %v1438_v42  ;;  %v1554_v47 = vpop.f32.mrb[8].mxu0 }
 0x3d5   : > { %v813_v49 = vmul.f32 %v811_v45, %v393_v37  ;;  %v799_v50 = vsub.f32 %v1541_v35, %v1554_v47  ;;  %v789_v51 = vpop.f32.mrb[9].mxu0 }
 0x3d6   : > { %v812_v52 = vmul.f32 %v810_v46, %v392_v38  ;;  %v798_v54 = vsub.f32 %v694_v36, %v789_v51 }
 0x3d7   : > { %v803_v55 = vmul.f32 %v799_v50, %v393_v37 }
 0x3d8   : > { %v802_v57 = vmul.f32 %v798_v54, %v392_v38  ;;  %v1718_v58 = vpack.i.bf16 %v813_v49, %v812_v52 }
 0x3d9   : > { %v805_v59 = vsub.f32 %v803_v55, %v395_v53 }
 0x3da   : > { %v804_v60 = vsub.f32 %v802_v57, %v394_v56  ;;  %1719 = vrot.lane.b32.xlu1 %v1718_v58, %s1984_s8 }
 0x3db   : > { %v807_v61 = vmul.f32 %v805_v59, %v393_v37 }
 0x3dc   : > { %v806_v62 = vmul.f32 %v804_v60, %v392_v38 }
 0x44c   : > { %v1720_v63 = vpop.permute.xlu1 %1719 }
 0x44d   : > { %v1722_v2 = vunpack.i.h.bf16 %v1720_v63  ;;  %v1721_v3 = vunpack.i.l.bf16 %v1720_v63 }
 0x44f   : > { %v822_v4 = vsel %vm429_vm0, %v806_v62, %v1721_v3  ;;  %v823_v7 = vsel %vm429_vm0, %v807_v61, %v1722_v2 }
 0x450   : > { %v1605_v8 = vpack.c.bf16 %v823_v7, %v822_v4 }
 0x452   : > { %1606 = vmatprep.subr.bf16.mxu1 %v1605_v8 }
 0x453   : > { %1608 = vmatpush3.bf16.msra.mxu1 %v1605_v8 }
 0x454   : > { %1610 = vmatprep.subr.bf16.mxu1 %v1605_v8 }
 0x456   : > { %1560 = vmatmul.mubr.msk.f32.vlgmr.msra.gmra.mrb[0].mxu1 %vm429_vm0, %v406_v9 }
 0x457   : > { %1612 = vmatpush3.bf16.msra.mxu1 %v1605_v8  ;;  %1566 = vmatprep.mubr.msk.f32.mxu1 %vm429_vm0, %v408_v10 }
 0x458   : > { %1614 = vmatprep.subr.bf16.mxu1 %v1613_v14 }
 0x45a   : > { %1567 = vmatmul.mubr.msk.f32.vlgmr.msra.gmra.mrb[2].mxu1 %vm429_vm0, %v409_v11 }
 0x45b   : > { %1616 = vmatpush3.bf16.msra.mxu1 %v1613_v14 }
 0x45c   : > { %1618 = vmatprep.subr.bf16.mxu1 %v1617_v19 }
 0x529   : > { %v1561_v15 = vpop.f32.mrb[0].mxu1 }
 0x52a   : > { %v896_v18 = vpop.f32.mrb[1].mxu1 }
 0x52d   : > { %v1568_v20 = vpop.f32.mrb[2].mxu1 }
 0x52e   : > { %998 = vrot.lane.b32.xlu1 %v1568_v20, %s1984_s8  ;;  %v977_v21 = vpop.f32.mrb[3].mxu1 }
 0x52f   : > { %996 = vrot.lane.b32.xlu0 %v977_v21, %s1984_s8 }
 0x532   : > { %990 = vrot.lane.b32.xlu1 %v1568_v20, %s1985_s13 }
 0x533   : > { %988 = vrot.lane.b32.xlu0 %v977_v21, %s1985_s13 }
 0x5a0   : > { %v999_v22 = vpop.permute.xlu1 %998 }
 0x5a1   : > { %v1003_v23 = vadd.f32 %v1561_v15, %v999_v22  ;;  %v997_v24 = vpop.permute.xlu0 %996 }
 0x5a2   : > { %v1002_v25 = vadd.f32 %v997_v24, %v896_v18 }
 0x5a3   : > { %1008 = vrot.lane.b32.xlu1 %v1003_v23, %s1985_s13 }
 0x5a4   : > { %v991_v26 = vpop.permute.xlu1 %990  ;;  %1006 = vrot.lane.b32.xlu0 %v1002_v25, %s1985_s13 }
 0x5a5   : > { %v989_v27 = vpop.permute.xlu0 %988  ;;  %v995_v29 = vsub.f32 %v1561_v15, %v991_v26 }
 0x5a6   : > { %v994_v28 = vsub.f32 %v896_v18, %v989_v27 }
 0x5a8   : > { %1573 = vmatprep.mubr.msk.f32.mxu1 %vm429_vm0, %v994_v28 }
 0x5a9   : > { %1574 = vmatmul.mubr.msk.f32.vlgmr.msra.gmra.mrb[4].mxu1 %vm429_vm0, %v995_v29 }
 0x5aa   : > { %1620 = vmatpush3.bf16.msra.mxu1 %v1617_v19 }
 0x615   : > { %v1009_v31 = vpop.permute.xlu1 %1008 }
 0x616   : > { %v1007_v30 = vpop.permute.xlu0 %1006 }
 0x617   : > { %1576 = vmatprep.mubr.msk.f32.mxu1 %vm429_vm0, %v1007_v30 }
 0x618   : > { %1577 = vmatmul.mubr.msk.f32.gmra.mrb[6].mxu1 %vm429_vm0, %v1009_v31 }
 0x619   : > { %1583 = vmatprep.mubr.msk.f32.mxu1 %vm429_vm0, %v994_v28 }
 0x620   : > { %1584 = vmatmul.mubr.msk.f32.vlgmr.msra.gmra.mrb[6].mxu1 %vm429_vm0, %v995_v29 }
 0x621   : > { %1586 = vmatprep.mubr.msk.f32.mxu1 %vm429_vm0, %v1007_v30 }
 0x624   : > { %1587 = vmatmul.mubr.msk.f32.gmra.mrb[8].mxu1 %vm429_vm0, %v1009_v31 }
 0x67c   : > { %v1575_v32 = vpop.f32.mrb[4].mxu1 }
 0x67d   : > { %v1086_v33 = vpop.f32.mrb[5].mxu1 }
 0x6f3   : > { %v1585_v34 = vpop.f32.mrb[6].mxu1 }
 0x6f4   : > { %1465 = vst.msk [vmem:[%s379_s14 + $0x18] sm:$0xff] %vm429_vm0, %v1585_v34  ;;  %v1206_v35 = vmul.f32 0.5, %v1585_v34  ;;  %v1171_v36 = vpop.f32.mrb[7].mxu1 }
 0x6f5   : > { %1464 = vst.msk [vmem:[%s379_s14 + $0x10] sm:$0xff] %vm429_vm0, %v1171_v36  ;;  %v1205_v37 = vmul.f32 0.5, %v1171_v36 }
 0x6f6   : > { %v1208_v38 = vsub.f32 %v2308_v1, %v1206_v35 }
 0x6f7   : > { %v1207_v39 = vsub.f32 %v2306_v0, %v1205_v37  ;;  %v1588_v40 = vpop.f32.mrb[8].mxu1 }
 0x6f8   : > { %1467 = vst.msk [vmem:[%s2375_s16 + $0x18] sm:$0xff] %vm429_vm0, %v1208_v38  ;;  %v1191_v41 = vsub.f32 %v1575_v32, %v1588_v40  ;;  %v1181_v42 = vpop.f32.mrb[9].mxu1 }
 0x6f9   : > { %1466 = vst.msk [vmem:[%s2375_s16 + $0x10] sm:$0xff] %vm429_vm0, %v1207_v39  ;;  %v1190_v0 = vsub.f32 %v1086_v33, %v1181_v42 }
 0x6fa   : > { %1195 = vst.msk [vmem:[%s379_s14 + $0x8] sm:$0xff] %vm429_vm0, %v1191_v41  ;;  %v1200_v1 = vmul.f32 0.5, %v1191_v41 }
 0x6fb   : > { %1194 = vst.msk [vmem:[%s379_s14] sm:$0xff] %vm429_vm0, %v1190_v0  ;;  %v1199_v43 = vmul.f32 0.5, %v1190_v0 }
 0x6fc   : > { %v1202_v44 = vsub.f32 %v2316_v6, %v1200_v1 }
 0x6fd   : > { %1882 = shalt.err (!%p1879_p1)
}
 0x6fe   : > { %s1883_s11 = scalar_lea.hbm %s2384_s15, 512  ;;  %s1887_s20 = scalar_lea.hbm %s2485_s5, 1024 }
 0x6ff   : > { %p1884_p0 = scmp.ne.s32.totalorder %s2384_s15, %s1883_s11  ;;  %p1888_p4 = scmp.lt.u32.totalorder %s2384_s15, %s2485_s5 }
 0x700   : > { %p1889_p13 = scmp.lt.u32.totalorder %s1887_s20, %s1883_s11  ;;  %p1891_p3 = scmp.lt.u32.totalorder %s1883_s11, %s2384_s15 }
 0x701   : > { %p1885_p5 = pnand %p1884_p0, %p2532_p7 }
 0x702   : > { %p1890_p12 = por %p1889_p13, %p1888_p4 }
 0x703   : > { %p1886_p11 = pneg %p1885_p5 }
 0x704   : > { %p1892_p2 = por %p1891_p3, %p1890_p12 }
 0x706   : > { %p1893_p6 = pnand %p1892_p2, %p1886_p11 }
 0x708   : > { %1896 = shalt.err (!%p1893_p6)
}
 0x709   : > { %s1987_s13 = smov 128   ;;  %s1988_s14 = smov 8   ;;  %v1201_v6 = vsub.f32 %v2314_v5, %v1199_v43  ;;  %1204 = vst.msk [vmem:[%s2375_s16 + $0x8] sm:$0xff] %vm429_vm0, %v1202_v44 }
 0x70a   : > { %1639 = dma.vmem_to_hbm [thread:$0]  (%p2532_p7), %s2371_s28, 512, %s2384_s15, %s1213_s23, %s1987_s13, %s1987_s13, %s1988_s14  }
 0x70b   : > { %s2425_s12 = scalar_lea.hbm %s2486_s6, %s1479_s29  ;;  %1203 = vst.msk [vmem:[%s2375_s16] sm:$0xff] %vm429_vm0, %v1201_v6  ;;  %s1218_s1 = scalar_lea.sflag [#allocation13], %s2280_s17 }
 0x70c   : > { %s1897_s28 = scalar_lea.vmem %s2429_s30, 512  ;;  %s1989_s25 = smov [#allocation12]  }
 0x70d   : > { %p1898_p8 = scmp.ne.s32.totalorder %s2429_s30, %s1897_s28  ;;  %s1901_s15 = sshll.u32 %s1989_s25, 4  ;;  %s1902_s15 = int_to_ptr.vmem [resolvable:$false] %s1901_s15 }
 0x70e   : > { %s1903_s29 = scalar_lea.vmem %s1902_s15, 1024  ;;  %p1904_p1 = scmp.lt.s32.totalorder %s2429_s30, %s1902_s15 }
 0x70f   : > { %p1899_p9 = pnand %p1898_p8, %p2532_p7  ;;  %p1905_p0 = scmp.lt.s32.totalorder %s1903_s29, %s1897_s28 }
 0x711   : > { %p1900_p10 = pneg %p1899_p9  ;;  %p1906_p5 = por %p1905_p0, %p1904_p1 }
 0x713   : > { %p1907_p11 = pnand %p1906_p5, %p1900_p10 }
 0x715   : > { %1910 = shalt.err (!%p1907_p11)
}
 0x716   : > { %s1911_s16 = scalar_lea.hbm %s2425_s12, 512  ;;  %s1915_s10 = scalar_lea.hbm %s2486_s6, 1024 }
 0x717   : > { %p1912_p4 = scmp.ne.s32.totalorder %s2425_s12, %s1911_s16  ;;  %p1916_p3 = scmp.lt.u32.totalorder %s2425_s12, %s2486_s6 }
 0x718   : > { %p1917_p2 = scmp.lt.u32.totalorder %s1915_s10, %s1911_s16  ;;  %p1919_p8 = scmp.lt.u32.totalorder %s1911_s16, %s2425_s12 }
 0x719   : > { %p1913_p13 = pnand %p1912_p4, %p2532_p7 }
 0x71a   : > { %p1918_p6 = por %p1917_p2, %p1916_p3 }
 0x71b   : > { %p1914_p12 = pneg %p1913_p13 }
 0x71c   : > { %p1920_p9 = por %p1919_p8, %p1918_p6 }
 0x71e   : > { %p1921_p10 = pnand %p1920_p9, %p1914_p12 }
 0x720   : > { %1924 = shalt.err (!%p1921_p10)
}
 0x721   : > { %1640 = dma.vmem_to_hbm [thread:$0]  (%p2532_p7), %s2429_s30, 512, %s2425_s12, %s1218_s1, %s1987_s13, %s1987_s13, %s1988_s14  }
 0x722 PF: > { %s2533_s7 = sld [smem:[#allocation22_spill]]  ;;  %s1262_s20 = sand.u32 1, %s1963_s21  }
 0x723   : > { %p2535_p0 = scmp.ge.s32.totalorder %s1975_s24, 2  ;;  %s1263_s3 = scalar_lea.sflag [#allocation4], %s1262_s20 }
 0x728   : > { %p2534_p1 = scmp.ne.s32.totalorder %s2533_s7, 0 }
 0x72a   : > { %p1661_p5 = pnand %p2535_p0, %p2534_p1 }
 0x72c   : > { %1954 = dma.done.wait (!%p1661_p5), %s1263_s3, 512  }
 0x72d   : > { %1956 = vsyncadd (!%p1661_p5), %s1263_s3, 4294966784  ;;  %s1272_s9 = scalar_lea.sflag [#allocation13], %s1262_s20 }
 0x72e   : > { %1958 = dma.done.wait (!%p1661_p5), %s1272_s9, 512  }
 0x72f   : > { %1960 = vsyncadd (!%p1661_p5), %s1272_s9, 4294966784  ;;  %s2536_s24 = sld [smem:[#allocation20_spill]]  ;;  %s2537_s17 = sld [smem:[#allocation19_spill]] }
 0x730   : > { %s2538_s23 = sld [smem:[#allocation21_spill]]  ;;  %s2539_s21 = smov %s1967_s22 }
 0x735   : > { %p27_p7 = scmp.ge.s32.totalorder %s2536_s24, 4   ;;  %s2540_s22 = smov %s2537_s17 }
 0x737   :  { %29 = sbr.rel (!%p27_p7) target bundleno = 13 (0xd), region = 144 }
 0x73e   :  { %1277 = vsyncpa [#allocation3], 1 }
 0x73f   :  { %1279 = vsyncpa [#allocation3 + $0x1], 1 }
 0x740   :  { %1280 = vsyncpa [#allocation6], 1 }
 0x741   :  { %1282 = vsyncpa [#allocation6 + $0x1], 1 }
 0x742   :  { %1283 = vsyncpa [#allocation9], 1 }
 0x743   :  { %1284 = vsyncpa [#allocation4], 1 }
 0x744   :  { %1286 = vsyncpa [#allocation4 + $0x1], 1 }
 0x745   :  { %1287 = vsyncpa [#allocation13], 1 }
 0x746   :  { %1289 = vsyncpa [#allocation13 + $0x1], 1 }

</bundles_post_ra>
